<compile_context>
chip_gen: v7x
topology: tpu7x:2x2x1
jax: 0.10.0
libtpu: 0.0.40
codegen_flags: <defaults>
</compile_context>

<pallas_src>
import functools

import jax
import jax.numpy as jnp
from jax.experimental import pallas as pl
from jax.experimental.pallas import tpu as pltpu

NUM_LAYERS = 5
FEAT = 128  # lane-padded feature width shared by layers 1..4 and the output


def mlp_kernel(x_ref, w0_ref, w_ref, b_ref, o_ref):
    # x_ref : (TB, in_dim)            raw input block (no lane padding in HBM)
    # w0_ref: (in_dim, 128)           layer-0 weight, pre-transposed [in, out]
    # w_ref : (4, 128, 128)           layers 1..4, pre-transposed, zero-padded
    # b_ref : (5, 1, 128)             f32 biases, zero-padded
    # o_ref : (TB, 128)               lane-dense output (true logits in [:out_dim])
    h = jnp.dot(x_ref[...], w0_ref[...], preferred_element_type=jnp.float32)
    h = jnp.maximum(h + b_ref[0], 0.0)
    for l in range(1, NUM_LAYERS):  # static Python unroll; all dims tiny
        h = jnp.dot(h.astype(w_ref.dtype), w_ref[l - 1],
                    preferred_element_type=jnp.float32) + b_ref[l]
        if l < NUM_LAYERS - 1:
            h = jnp.maximum(h, 0.0)
    o_ref[...] = h.astype(o_ref.dtype)


def _round_up(n, m):
    return ((n + m - 1) // m) * m


def _choose_tb(B):
    """Batch tile: multiple of 8; >=2 grid steps when possible (v7x megacore);
    capped at 512 rows to amortize per-step overhead without huge padding."""
    B8 = _round_up(max(B, 1), 8)
    if B8 <= 8:
        return 8
    return min(512, _round_up(pl.cdiv(B8, 2), 8))


def pack_params(params, dtype=jnp.bfloat16):
    """One-time packing of PyTorch-style (W [out,in], b [out]) params into
    zero-padded, pre-transposed slabs.  Call once and reuse across forwards."""
    in_dim = params[0][0].shape[1]
    w0 = jnp.zeros((in_dim, FEAT), dtype)
    w0 = w0.at[:, :params[0][0].shape[0]].set(params[0][0].T.astype(dtype))
    w_slab = jnp.zeros((NUM_LAYERS - 1, FEAT, FEAT), dtype)
    b_slab = jnp.zeros((NUM_LAYERS, 1, FEAT), jnp.float32)
    b_slab = b_slab.at[0, 0, :params[0][1].shape[0]].set(params[0][1])
    for l in range(1, NUM_LAYERS):
        w, b = params[l]
        o_d, i_d = w.shape
        w_slab = w_slab.at[l - 1, :i_d, :o_d].set(w.T.astype(dtype))
        b_slab = b_slab.at[l, 0, :o_d].set(b)
    return w0, w_slab, b_slab


@functools.partial(jax.jit, static_argnames=("out_dim",))
def mlp_forward(x, w0, w_slab, b_slab, *, out_dim):
    """x: [B, in_dim] float32; slabs from pack_params (dtype of w0/w_slab sets
    the MXU compute dtype).  Returns [B, out_dim] float32 logits."""
    B, in_dim = x.shape
    compute_dtype = w_slab.dtype

    TB = _choose_tb(B)
    B_pad = _round_up(B, TB)

    xc = x.astype(compute_dtype)
    if B_pad != B:
        xc = jnp.pad(xc, ((0, B_pad - B), (0, 0)))  # tiny: batch dim only, 4 lanes

    grid = (B_pad // TB,)
    out = pl.pallas_call(
        mlp_kernel,
        out_shape=jax.ShapeDtypeStruct((B_pad, FEAT), compute_dtype),
        grid=grid,
        in_specs=[
            pl.BlockSpec((TB, in_dim), lambda i: (i, 0)),                      # activations (pipelined)
            pl.BlockSpec((in_dim, FEAT), lambda i: (0, 0)),                    # layer-0 weight (resident)
            pl.BlockSpec((NUM_LAYERS - 1, FEAT, FEAT), lambda i: (0, 0, 0)),   # layers 1..4 (resident)
            pl.BlockSpec((NUM_LAYERS, 1, FEAT), lambda i: (0, 0, 0)),          # biases (resident)
        ],
        out_specs=pl.BlockSpec((TB, FEAT), lambda i: (i, 0)),
        compiler_params=pltpu.CompilerParams(
            dimension_semantics=("parallel",)),
    )(xc, w0, w_slab, b_slab)

    # Layout plumbing: drop batch padding and padded lanes, return f32 logits.
    return out[:B, :out_dim].astype(jnp.float32)


def init_params(key, input_dim=4, output_dim=3):
    """Deterministic PyTorch-Linear-style init (uniform +/- 1/sqrt(fan_in))."""
    dims = [input_dim, 64, 32, 32, 16, output_dim]
    params = []
    for i in range(len(dims) - 1):
        fan_in, fan_out = dims[i], dims[i + 1]
        key, kw, kb = jax.random.split(key, 3)
        bound = 1.0 / jnp.sqrt(fan_in)
        w = jax.random.uniform(kw, (fan_out, fan_in), jnp.float32, -bound, bound)
        b = jax.random.uniform(kb, (fan_out,), jnp.float32, -bound, bound)
        params.append((w, b))
    return params


def reference_forward(x, params):
    h = x
    for i, (w, b) in enumerate(params):
        h = h @ w.T + b
        if i < len(params) - 1:
            h = jnp.maximum(h, 0.0)
    return h


if __name__ == "__main__":
    key = jax.random.PRNGKey(0)
    key, kx = jax.random.split(key)

    batch = 8
    input_dim = 4   # iris features
    output_dim = 3  # iris classes

    x = jax.random.normal(kx, (batch, input_dim), dtype=jnp.float32)
    params = init_params(key, input_dim, output_dim)
    ref = reference_forward(x, params)

    # Exact-precision path (f32 slabs): tight tolerance.
    packed_f32 = pack_params(params, dtype=jnp.float32)
    out_f32 = jax.block_until_ready(mlp_forward(x, *packed_f32, out_dim=output_dim))
    assert out_f32.shape == (batch, output_dim)
    assert jnp.allclose(out_f32, ref, atol=1e-5, rtol=1e-5)

    # Performance path (default bf16 MXU inputs, f32 accumulation): loose tolerance.
    packed_bf16 = pack_params(params, dtype=jnp.bfloat16)
    out_bf16 = jax.block_until_ready(mlp_forward(x, *packed_bf16, out_dim=output_dim))
    assert out_bf16.shape == (batch, output_dim)
    assert jnp.allclose(out_bf16, ref, atol=5e-2, rtol=5e-2)

    print("KERNEL_OK")
</pallas_src>

<mosaic_0001>
module attributes {stable_mosaic.version = 11 : i64} {
  func.func @mlp_kernel(%arg0: i32, %arg1: memref<8x4xf32, #tpu.memory_space<vmem>>, %arg2: memref<4x128xf32, #tpu.memory_space<vmem>>, %arg3: memref<4x128x128xf32, #tpu.memory_space<vmem>>, %arg4: memref<5x1x128xf32, #tpu.memory_space<vmem>>, %arg5: memref<8x128xf32, #tpu.memory_space<vmem>>) attributes {dimension_semantics = [#tpu.dimension_semantics<parallel>], iteration_bounds = array<i64: 1>, scalar_prefetch = 0 : i64, scratch_operands = 0 : i64, tpu.core_type = #tpu.core_type<tc>, window_params = [{transform_indices = @transform_0, window_bounds = array<i64: 8, 4>}, {pipeline_mode = #tpu.pipeline_mode<synchronous>, transform_indices = @transform_1, window_bounds = array<i64: 4, 128>}, {pipeline_mode = #tpu.pipeline_mode<synchronous>, transform_indices = @transform_2, window_bounds = array<i64: 4, 128, 128>}, {pipeline_mode = #tpu.pipeline_mode<synchronous>, transform_indices = @transform_3, window_bounds = array<i64: 5, 1, 128>}, {transform_indices = @transform_4, window_bounds = array<i64: 8, 128>}]} {
    %c0 = arith.constant 0 : index
    %c0_0 = arith.constant 0 : index
    %0 = vector.load %arg1[%c0, %c0_0] : memref<8x4xf32, #tpu.memory_space<vmem>>, vector<8x4xf32>
    %c0_1 = arith.constant 0 : index
    %c0_2 = arith.constant 0 : index
    %1 = vector.load %arg2[%c0_1, %c0_2] : memref<4x128xf32, #tpu.memory_space<vmem>>, vector<4x128xf32>
    %cst = arith.constant dense<0.000000e+00> : vector<8x128xf32>
    %2 = tpu.matmul %0, %1, %cst {dimension_numbers = #tpu.dot_dimension_numbers<[1], [0], [0], [1], [0, 0, 1, 1], [], []>} : vector<8x4xf32>, vector<4x128xf32>, vector<8x128xf32> -> vector<8x128xf32>
    %c0_3 = arith.constant 0 : index
    %c0_4 = arith.constant 0 : index
    %c0_5 = arith.constant 0 : index
    %3 = vector.load %arg4[%c0_3, %c0_4, %c0_5] : memref<5x1x128xf32, #tpu.memory_space<vmem>>, vector<1x1x128xf32>
    %4 = vector.shape_cast %3 : vector<1x1x128xf32> to vector<1x128xf32>
    %5 = vector.broadcast %4 : vector<1x128xf32> to vector<8x128xf32>
    %6 = arith.addf %2, %5 : vector<8x128xf32>
    %cst_6 = arith.constant 0.000000e+00 : f32
    %7 = vector.broadcast %cst_6 : f32 to vector<8x128xf32>
    %8 = arith.maximumf %6, %7 : vector<8x128xf32>
    %c0_7 = arith.constant 0 : index
    %c0_8 = arith.constant 0 : index
    %c0_9 = arith.constant 0 : index
    %9 = vector.load %arg3[%c0_7, %c0_8, %c0_9] : memref<4x128x128xf32, #tpu.memory_space<vmem>>, vector<1x128x128xf32>
    %10 = vector.shape_cast %9 : vector<1x128x128xf32> to vector<128x128xf32>
    %cst_10 = arith.constant dense<0.000000e+00> : vector<8x128xf32>
    %11 = tpu.matmul %8, %10, %cst_10 {dimension_numbers = #tpu.dot_dimension_numbers<[1], [0], [0], [1], [0, 0, 1, 1], [], []>} : vector<8x128xf32>, vector<128x128xf32>, vector<8x128xf32> -> vector<8x128xf32>
    %c1 = arith.constant 1 : index
    %c0_11 = arith.constant 0 : index
    %c0_12 = arith.constant 0 : index
    %12 = vector.load %arg4[%c1, %c0_11, %c0_12] : memref<5x1x128xf32, #tpu.memory_space<vmem>>, vector<1x1x128xf32>
    %13 = vector.shape_cast %12 : vector<1x1x128xf32> to vector<1x128xf32>
    %14 = vector.broadcast %13 : vector<1x128xf32> to vector<8x128xf32>
    %15 = arith.addf %11, %14 : vector<8x128xf32>
    %cst_13 = arith.constant 0.000000e+00 : f32
    %16 = vector.broadcast %cst_13 : f32 to vector<8x128xf32>
    %17 = arith.maximumf %15, %16 : vector<8x128xf32>
    %c1_14 = arith.constant 1 : index
    %c0_15 = arith.constant 0 : index
    %c0_16 = arith.constant 0 : index
    %18 = vector.load %arg3[%c1_14, %c0_15, %c0_16] : memref<4x128x128xf32, #tpu.memory_space<vmem>>, vector<1x128x128xf32>
    %19 = vector.shape_cast %18 : vector<1x128x128xf32> to vector<128x128xf32>
    %cst_17 = arith.constant dense<0.000000e+00> : vector<8x128xf32>
    %20 = tpu.matmul %17, %19, %cst_17 {dimension_numbers = #tpu.dot_dimension_numbers<[1], [0], [0], [1], [0, 0, 1, 1], [], []>} : vector<8x128xf32>, vector<128x128xf32>, vector<8x128xf32> -> vector<8x128xf32>
    %c2 = arith.constant 2 : index
    %c0_18 = arith.constant 0 : index
    %c0_19 = arith.constant 0 : index
    %21 = vector.load %arg4[%c2, %c0_18, %c0_19] : memref<5x1x128xf32, #tpu.memory_space<vmem>>, vector<1x1x128xf32>
    %22 = vector.shape_cast %21 : vector<1x1x128xf32> to vector<1x128xf32>
    %23 = vector.broadcast %22 : vector<1x128xf32> to vector<8x128xf32>
    %24 = arith.addf %20, %23 : vector<8x128xf32>
    %cst_20 = arith.constant 0.000000e+00 : f32
    %25 = vector.broadcast %cst_20 : f32 to vector<8x128xf32>
    %26 = arith.maximumf %24, %25 : vector<8x128xf32>
    %c2_21 = arith.constant 2 : index
    %c0_22 = arith.constant 0 : index
    %c0_23 = arith.constant 0 : index
    %27 = vector.load %arg3[%c2_21, %c0_22, %c0_23] : memref<4x128x128xf32, #tpu.memory_space<vmem>>, vector<1x128x128xf32>
    %28 = vector.shape_cast %27 : vector<1x128x128xf32> to vector<128x128xf32>
    %cst_24 = arith.constant dense<0.000000e+00> : vector<8x128xf32>
    %29 = tpu.matmul %26, %28, %cst_24 {dimension_numbers = #tpu.dot_dimension_numbers<[1], [0], [0], [1], [0, 0, 1, 1], [], []>} : vector<8x128xf32>, vector<128x128xf32>, vector<8x128xf32> -> vector<8x128xf32>
    %c3 = arith.constant 3 : index
    %c0_25 = arith.constant 0 : index
    %c0_26 = arith.constant 0 : index
    %30 = vector.load %arg4[%c3, %c0_25, %c0_26] : memref<5x1x128xf32, #tpu.memory_space<vmem>>, vector<1x1x128xf32>
    %31 = vector.shape_cast %30 : vector<1x1x128xf32> to vector<1x128xf32>
    %32 = vector.broadcast %31 : vector<1x128xf32> to vector<8x128xf32>
    %33 = arith.addf %29, %32 : vector<8x128xf32>
    %cst_27 = arith.constant 0.000000e+00 : f32
    %34 = vector.broadcast %cst_27 : f32 to vector<8x128xf32>
    %35 = arith.maximumf %33, %34 : vector<8x128xf32>
    %c3_28 = arith.constant 3 : index
    %c0_29 = arith.constant 0 : index
    %c0_30 = arith.constant 0 : index
    %36 = vector.load %arg3[%c3_28, %c0_29, %c0_30] : memref<4x128x128xf32, #tpu.memory_space<vmem>>, vector<1x128x128xf32>
    %37 = vector.shape_cast %36 : vector<1x128x128xf32> to vector<128x128xf32>
    %cst_31 = arith.constant dense<0.000000e+00> : vector<8x128xf32>
    %38 = tpu.matmul %35, %37, %cst_31 {dimension_numbers = #tpu.dot_dimension_numbers<[1], [0], [0], [1], [0, 0, 1, 1], [], []>} : vector<8x128xf32>, vector<128x128xf32>, vector<8x128xf32> -> vector<8x128xf32>
    %c4 = arith.constant 4 : index
    %c0_32 = arith.constant 0 : index
    %c0_33 = arith.constant 0 : index
    %39 = vector.load %arg4[%c4, %c0_32, %c0_33] : memref<5x1x128xf32, #tpu.memory_space<vmem>>, vector<1x1x128xf32>
    %40 = vector.shape_cast %39 : vector<1x1x128xf32> to vector<1x128xf32>
    %41 = vector.broadcast %40 : vector<1x128xf32> to vector<8x128xf32>
    %42 = arith.addf %38, %41 : vector<8x128xf32>
    %c0_34 = arith.constant 0 : index
    %c0_35 = arith.constant 0 : index
    %43 = vector.load %arg5[%c0_34, %c0_35] : memref<8x128xf32, #tpu.memory_space<vmem>>, vector<8x128xf32>
    tpu.vector_store %arg5[%c0_34, %c0_35], %42 {strides = array<i32>} : memref<8x128xf32, #tpu.memory_space<vmem>>, vector<8x128xf32>,
    return
  }
  func.func @transform_0(%arg0: i32) -> (i32, i32) {
    %c0_i32 = arith.constant 0 : i32
    %c0_i32_0 = arith.constant 0 : i32
    return %arg0, %c0_i32 : i32, i32
  }
  func.func @transform_1(%arg0: i32) -> (i32, i32) {
    %c0_i32 = arith.constant 0 : i32
    %c0_i32_0 = arith.constant 0 : i32
    %c0_i32_1 = arith.constant 0 : i32
    return %c0_i32, %c0_i32_0 : i32, i32
  }
  func.func @transform_2(%arg0: i32) -> (i32, i32, i32) {
    %c0_i32 = arith.constant 0 : i32
    %c0_i32_0 = arith.constant 0 : i32
    %c0_i32_1 = arith.constant 0 : i32
    %c0_i32_2 = arith.constant 0 : i32
    return %c0_i32, %c0_i32_0, %c0_i32_1 : i32, i32, i32
  }
  func.func @transform_3(%arg0: i32) -> (i32, i32, i32) {
    %c0_i32 = arith.constant 0 : i32
    %c0_i32_0 = arith.constant 0 : i32
    %c0_i32_1 = arith.constant 0 : i32
    %c0_i32_2 = arith.constant 0 : i32
    return %c0_i32, %c0_i32_0, %c0_i32_1 : i32, i32, i32
  }
  func.func @transform_4(%arg0: i32) -> (i32, i32) {
    %c0_i32 = arith.constant 0 : i32
    %c0_i32_0 = arith.constant 0 : i32
    return %arg0, %c0_i32 : i32, i32
  }
}

</mosaic_0001>

<bundles_post_ra>
// kernel: mlp_forward.1
= control target key start
LH: loop header
LB: loop body
LE: loop exit
PB: predicated region body
PF: predicated region fallthrough
CT: control target
= control target key end

     0   :  { %9 = vsyncpa [#allocation3], 0  ;;  %s859_s15 = smov [#allocation2]   ;;  %s969_s0 = inlined_call_operand.vmem [shape: f32[8,4], index: 0, kind: input, shape index: {}]   ;;  %s970_s1 = inlined_call_operand.vmem [shape: f32[4,128], index: 1, kind: input, shape index: {}]   ;;  %s971_s2 = inlined_call_operand.hbm [shape: f32[4,128,128], index: 2, kind: input, shape index: {}]   ;;  %s972_s3 = inlined_call_operand.vmem [shape: f32[5,1,128], index: 3, kind: input, shape index: {}]   ;;  %s973_s4 = inlined_call_operand.vmem [shape: f32[8,128], index: 4, kind: output, shape index: {}]  }
   0x1   :  { %s19_s16 = sshll.u32 %s859_s15, 4  ;;  %s835_s19 = scalar_lea.hbm %s971_s2, 8192  ;;  %s20_s16 = int_to_ptr.vmem [resolvable:$true] %s19_s16 }
   0x2   :  { %p836_p0 = scmp.ne.s32.totalorder %s971_s2, %s835_s19  ;;  %p839_p1 = scmp.lt.u32.totalorder %s835_s19, %s971_s2 }
   0x4   :  { %p841_p2 = pnand %p839_p1, %p836_p0 }
   0x6   :  { %844 = shalt.err (!%p841_p2)
}
   0x7   :  { %s845_s24 = scalar_lea.vmem %s20_s16, 8192  ;;  %p850_p4 = scmp.lt.s32.totalorder %s20_s16, %s20_s16 }
   0x8   :  { %p846_p3 = scmp.ne.s32.totalorder %s20_s16, %s845_s24  ;;  %p851_p5 = scmp.lt.s32.totalorder %s845_s24, %s845_s24 }
   0xa   :  { %p852_p6 = por %p851_p5, %p850_p4 }
   0xc   :  { %p853_p7 = pnand %p852_p6, %p846_p3 }
   0xe   :  { %856 = shalt.err (!%p853_p7)
}
   0xf   :  { %s860_s25 = smov 128   ;;  %s861_s26 = smov 8  }
  0x10   :  { %25 = dma.hbm_to_vmem [thread:$0]  %s971_s2, 8192, %s20_s16, [#allocation3], %s860_s25, %s860_s25, %s861_s26  }
  0x11   :  { %857 = dma.done.wait [#allocation3], 8192  }
  0x12   :  { %858 = vsyncadd [#allocation3], 4294959104  ;;  %v862_v0 = vmov 0.0   ;;  %vm863_vm0 = vmmov 0   ;;  %v864_v1 = vmov 0.0|0.0   ;;  %vm44_vm1 = vcmask 1043456  }
  0x13   :  { %588 = vmatprep.subr.mxu0 %v862_v0  ;;  %590 = vmatprep.mubr.msk.f32.mxu0 %vm863_vm0, %v862_v0  ;;  %vm40_vm2 = vcmask 31744   ;;  %v32_v2 = vld [vmem:[%s970_s1] sm:$0xf]  ;;  %v120_v5 = vld [vmem:[#allocation2 + $0x8] sm:$0xff]  ;;  %v121_v6 = vld [vmem:[#allocation2 + $0x10] sm:$0xff] }
  0x14   :  { %733 = vmatprep.subr.bf16.mxu1 %v864_v1  ;;  %625 = vmatprep.mubr.msk.f32.mxu1 %vm863_vm0, %v862_v0  ;;  %v31_v3 = vld [vmem:[%s969_s0] sm:$0xff]  ;;  %v122_v7 = vld [vmem:[#allocation2 + $0x18] sm:$0xff]  ;;  %v124_v11 = vld [vmem:[#allocation2 + $0x28] sm:$0xff] }
  0x15   :  { %v119_v4 = vld [vmem:[#allocation2] sm:$0xff]  ;;  %589 = vmatpush3.msk.msra.mxu0 %vm44_vm1, %v32_v2  ;;  %v737_v9 = vpack.c.bf16 %v122_v7, %v121_v6  ;;  %v125_v13 = vld [vmem:[#allocation2 + $0x30] sm:$0xff]  ;;  %v126_v14 = vld [vmem:[#allocation2 + $0x38] sm:$0xff] }
  0x16   :  { %591 = vmatmul.mubr.msk.f32.vlgmr.msra.gmra.mrb[0].mxu0 %vm40_vm2, %v31_v3  ;;  %v734_v8 = vpack.c.bf16 %v120_v5, %v119_v4  ;;  %757 = vmatprep.subr.bf16.mxu0 %v864_v1  ;;  %v123_v10 = vld [vmem:[#allocation2 + $0x20] sm:$0xff]  ;;  %v743_v15 = vpack.c.bf16 %v126_v14, %v125_v13  ;;  %v128_v17 = vld [vmem:[#allocation2 + $0x48] sm:$0xff]  ;;  %v129_v19 = vld [vmem:[#allocation2 + $0x50] sm:$0xff] }
  0x17   :  { %660 = vmatprep.mubr.msk.f32.mxu0 %vm863_vm0, %v862_v0  ;;  %v740_v12 = vpack.c.bf16 %v124_v11, %v123_v10  ;;  %v127_v16 = vld [vmem:[#allocation2 + $0x40] sm:$0xff]  ;;  %v130_v20 = vld [vmem:[#allocation2 + $0x58] sm:$0xff]  ;;  %v132_v23 = vld [vmem:[#allocation2 + $0x68] sm:$0xff] }
  0x18   :  { %735 = vmatpush3.bf16.msra.mxu1 %v734_v8  ;;  %v746_v18 = vpack.c.bf16 %v128_v17, %v127_v16  ;;  %v749_v21 = vpack.c.bf16 %v130_v20, %v129_v19  ;;  %v131_v22 = vld [vmem:[#allocation2 + $0x60] sm:$0xff]  ;;  %v133_v25 = vld [vmem:[#allocation2 + $0x70] sm:$0xff]  ;;  %v134_v26 = vld [vmem:[#allocation2 + $0x78] sm:$0xff] }
  0x19   :  { %736 = vmatprep.subr.bf16.mxu1 %v864_v1  ;;  %v752_v24 = vpack.c.bf16 %v132_v23, %v131_v22  ;;  %v755_v27 = vpack.c.bf16 %v134_v26, %v133_v25  ;;  %v215_v28 = vld [vmem:[#allocation2 + $0x80] sm:$0xff]  ;;  %v216_v29 = vld [vmem:[#allocation2 + $0x88] sm:$0xff]  ;;  %v217_v30 = vld [vmem:[#allocation2 + $0x90] sm:$0xff] }
  0x1a   :  { %v758_v31 = vpack.c.bf16 %v216_v29, %v215_v28  ;;  %v218_v32 = vld [vmem:[#allocation2 + $0x98] sm:$0xff]  ;;  %v219_v34 = vld [vmem:[#allocation2 + $0xa0] sm:$0xff]  ;;  %v220_v35 = vld [vmem:[#allocation2 + $0xa8] sm:$0xff] }
  0x1b   :  { %v761_v33 = vpack.c.bf16 %v218_v32, %v217_v30  ;;  %v764_v36 = vpack.c.bf16 %v220_v35, %v219_v34  ;;  %v221_v37 = vld [vmem:[#allocation2 + $0xb0] sm:$0xff]  ;;  %v222_v38 = vld [vmem:[#allocation2 + $0xb8] sm:$0xff]  ;;  %v223_v40 = vld [vmem:[#allocation2 + $0xc0] sm:$0xff] }
  0x1c   :  { %738 = vmatpush3.bf16.msra.mxu1 %v737_v9  ;;  %759 = vmatpush3.bf16.msra.mxu0 %v758_v31  ;;  %v767_v39 = vpack.c.bf16 %v222_v38, %v221_v37  ;;  %v224_v41 = vld [vmem:[#allocation2 + $0xc8] sm:$0xff]  ;;  %v225_v43 = vld [vmem:[#allocation2 + $0xd0] sm:$0xff]  ;;  %v226_v44 = vld [vmem:[#allocation2 + $0xd8] sm:$0xff] }
  0x1d   :  { %739 = vmatprep.subr.bf16.mxu1 %v864_v1  ;;  %760 = vmatprep.subr.bf16.mxu0 %v864_v1  ;;  %v770_v42 = vpack.c.bf16 %v224_v41, %v223_v40  ;;  %v773_v45 = vpack.c.bf16 %v226_v44, %v225_v43  ;;  %v227_v46 = vld [vmem:[#allocation2 + $0xe0] sm:$0xff]  ;;  %v228_v47 = vld [vmem:[#allocation2 + $0xe8] sm:$0xff]  ;;  %v229_v54 = vld [vmem:[#allocation2 + $0xf0] sm:$0xff] }
  0x1e   :  { %v776_v48 = vpack.c.bf16 %v228_v47, %v227_v46  ;;  %v507_v49 = vld [vmem:[%s972_s3] ss:$0 sm:$0xff]  ;;  %v230_v55 = vld [vmem:[#allocation2 + $0xf8] sm:$0xff]  ;;  %v312_v58 = vld [vmem:[#allocation2 + $0x108] sm:$0xff] }
  0x1f   :  { %v779_v56 = vpack.c.bf16 %v230_v55, %v229_v54  ;;  %v311_v57 = vld [vmem:[#allocation2 + $0x100] sm:$0xff]  ;;  %v313_v59 = vld [vmem:[#allocation2 + $0x110] sm:$0xff]  ;;  %v314_v61 = vld [vmem:[#allocation2 + $0x118] sm:$0xff] }
  0x20   :  { %741 = vmatpush3.bf16.msra.mxu1 %v740_v12  ;;  %762 = vmatpush3.bf16.msra.mxu0 %v761_v33  ;;  %v782_v60 = vpack.c.bf16 %v312_v58, %v311_v57  ;;  %v785_v62 = vpack.c.bf16 %v314_v61, %v313_v59  ;;  %v315_v63 = vld [vmem:[#allocation2 + $0x120] sm:$0xff]  ;;  %v316_v2 = vld [vmem:[#allocation2 + $0x128] sm:$0xff]  ;;  %v317_v4 = vld [vmem:[#allocation2 + $0x130] sm:$0xff] }
  0x21   :  { %742 = vmatprep.subr.bf16.mxu1 %v864_v1  ;;  %763 = vmatprep.subr.bf16.mxu0 %v864_v1  ;;  %v788_v3 = vpack.c.bf16 %v316_v2, %v315_v63  ;;  %v318_v5 = vld [vmem:[#allocation2 + $0x138] sm:$0xff]  ;;  %v319_v7 = vld [vmem:[#allocation2 + $0x140] sm:$0xff]  ;;  %v320_v8 = vld [vmem:[#allocation2 + $0x148] sm:$0xff] }
  0x22   :  { %v791_v6 = vpack.c.bf16 %v318_v5, %v317_v4  ;;  %v794_v9 = vpack.c.bf16 %v320_v8, %v319_v7  ;;  %v321_v10 = vld [vmem:[#allocation2 + $0x150] sm:$0xff]  ;;  %v322_v11 = vld [vmem:[#allocation2 + $0x158] sm:$0xff]  ;;  %v323_v13 = vld [vmem:[#allocation2 + $0x160] sm:$0xff] }
  0x23   :  { %v797_v12 = vpack.c.bf16 %v322_v11, %v321_v10  ;;  %v324_v14 = vld [vmem:[#allocation2 + $0x168] sm:$0xff]  ;;  %v511_v16 = vld [vmem:[%s972_s3 + $0x1] ss:$0 sm:$0xff]  ;;  %v326_v22 = vld [vmem:[#allocation2 + $0x178] sm:$0xff] }
  0x24   :  { %744 = vmatpush3.bf16.msra.mxu1 %v743_v15  ;;  %765 = vmatpush3.bf16.msra.mxu0 %v764_v36  ;;  %v800_v15 = vpack.c.bf16 %v324_v14, %v323_v13  ;;  %v408_v25 = vld [vmem:[#allocation2 + $0x188] sm:$0xff]  ;;  %v409_v26 = vld [vmem:[#allocation2 + $0x190] sm:$0xff]  ;;  %v410_v28 = vld [vmem:[#allocation2 + $0x198] sm:$0xff] }
  0x25   :  { %745 = vmatprep.subr.bf16.mxu1 %v864_v1  ;;  %766 = vmatprep.subr.bf16.mxu0 %v864_v1  ;;  %v809_v29 = vpack.c.bf16 %v410_v28, %v409_v26  ;;  %v411_v30 = vld [vmem:[#allocation2 + $0x1a0] sm:$0xff]  ;;  %v412_v31 = vld [vmem:[#allocation2 + $0x1a8] sm:$0xff]  ;;  %v414_v33 = vld [vmem:[#allocation2 + $0x1b8] sm:$0xff] }
  0x26   :  { %v812_v32 = vpack.c.bf16 %v412_v31, %v411_v30  ;;  %v415_v35 = vld [vmem:[#allocation2 + $0x1c0] sm:$0xff]  ;;  %v416_v36 = vld [vmem:[#allocation2 + $0x1c8] sm:$0xff]  ;;  %v417_v38 = vld [vmem:[#allocation2 + $0x1d0] sm:$0xff] }
  0x27   :  { %v818_v37 = vpack.c.bf16 %v416_v36, %v415_v35  ;;  %v419_v41 = vld [vmem:[#allocation2 + $0x1e0] sm:$0xff] }
  0x28   :  { %747 = vmatpush3.bf16.msra.mxu1 %v746_v18  ;;  %768 = vmatpush3.bf16.msra.mxu0 %v767_v39  ;;  %v418_v39 = vld [vmem:[#allocation2 + $0x1d8] sm:$0xff]  ;;  %v513_v44 = vld [vmem:[%s972_s3 + $0x2] ss:$0 sm:$0xff] }
  0x29   :  { %748 = vmatprep.subr.bf16.mxu1 %v864_v1  ;;  %769 = vmatprep.subr.bf16.mxu0 %v864_v1  ;;  %v821_v40 = vpack.c.bf16 %v418_v39, %v417_v38 }
  0x2c   :  { %750 = vmatpush3.bf16.msra.mxu1 %v749_v21  ;;  %771 = vmatpush3.bf16.msra.mxu0 %v770_v42  ;;  %v325_v21 = vld [vmem:[#allocation2 + $0x170] sm:$0xff]  ;;  %v420_v42 = vld [vmem:[#allocation2 + $0x1e8] sm:$0xff] }
  0x2d   :  { %751 = vmatprep.subr.bf16.mxu1 %v864_v1  ;;  %772 = vmatprep.subr.bf16.mxu0 %v864_v1  ;;  %v803_v23 = vpack.c.bf16 %v326_v22, %v325_v21  ;;  %v824_v43 = vpack.c.bf16 %v420_v42, %v419_v41 }
  0x30   :  { %753 = vmatpush3.bf16.msra.mxu1 %v752_v24  ;;  %774 = vmatpush3.bf16.msra.mxu0 %v773_v45  ;;  %v407_v24 = vld [vmem:[#allocation2 + $0x180] sm:$0xff] }
  0x31   :  { %754 = vmatprep.subr.bf16.mxu1 %v864_v1  ;;  %775 = vmatprep.subr.bf16.mxu0 %v864_v1 }
  0x34   :  { %756 = vmatpush3.bf16.msra.mxu1 %v755_v27  ;;  %777 = vmatpush3.bf16.msra.mxu0 %v776_v48  ;;  %v806_v27 = vpack.c.bf16 %v408_v25, %v407_v24 }
  0x35   :  { %781 = vmatprep.subr.bf16.mxu1 %v864_v1  ;;  %778 = vmatprep.subr.bf16.mxu0 %v864_v1 }
  0x38   :  { %780 = vmatpush3.bf16.msra.mxu0 %v779_v56  ;;  %v517_v56 = vld [vmem:[%s972_s3 + $0x4] ss:$0 sm:$0xff] }
  0x39   :  { %805 = vmatprep.subr.bf16.mxu0 %v864_v1 }
  0xe9   :  { %v114_v50 = vpop.f32.mrb[0].mxu0 }
  0xea   :  { %v115_v51 = vadd.f32 %v507_v49, %v114_v50  ;;  %v592_v52 = vpop.f32.mrb[1].mxu0  ;;  %v421_v49 = vld [vmem:[#allocation2 + $0x1f0] sm:$0xff]  ;;  %v422_v50 = vld [vmem:[#allocation2 + $0x1f8] sm:$0xff] }
  0xeb   :  { %v515_v52 = vld [vmem:[%s972_s3 + $0x3] ss:$0 sm:$0xff] }
  0xec   :  { %v118_v53 = vmax.f32 %v115_v51, 0.0  ;;  %v827_v51 = vpack.c.bf16 %v422_v50, %v421_v49 }
  0xee   :  { %626 = vmatmul.mubr.f32.vlgmr.msra.gmra.mrb[0].mxu1 %v118_v53 }
  0xef   :  { %695 = vmatprep.mubr.msk.f32.mxu1 %vm863_vm0, %v862_v0  ;;  %783 = vmatpush3.bf16.msra.mxu1 %v782_v60 }
  0xf0   :  { %784 = vmatprep.subr.bf16.mxu1 %v864_v1 }
  0xf3   :  { %786 = vmatpush3.bf16.msra.mxu1 %v785_v62 }
  0xf4   :  { %787 = vmatprep.subr.bf16.mxu1 %v864_v1 }
  0xf7   :  { %789 = vmatpush3.bf16.msra.mxu1 %v788_v3 }
  0xf8   :  { %790 = vmatprep.subr.bf16.mxu1 %v864_v1 }
  0xfb   :  { %792 = vmatpush3.bf16.msra.mxu1 %v791_v6 }
  0xfc   :  { %793 = vmatprep.subr.bf16.mxu1 %v864_v1 }
  0xff   :  { %795 = vmatpush3.bf16.msra.mxu1 %v794_v9 }
 0x100   :  { %796 = vmatprep.subr.bf16.mxu1 %v864_v1 }
 0x103   :  { %798 = vmatpush3.bf16.msra.mxu1 %v797_v12 }
 0x104   :  { %799 = vmatprep.subr.bf16.mxu1 %v864_v1 }
 0x107   :  { %801 = vmatpush3.bf16.msra.mxu1 %v800_v15 }
 0x108   :  { %802 = vmatprep.subr.bf16.mxu1 %v864_v1 }
 0x10b   :  { %804 = vmatpush3.bf16.msra.mxu1 %v803_v23 }
 0x1c1   :  { %v209_v17 = vpop.f32.mrb[0].mxu1 }
 0x1c2   :  { %v210_v18 = vadd.f32 %v511_v16, %v209_v17  ;;  %v627_v19 = vpop.f32.mrb[1].mxu1 }
 0x1c4   :  { %v213_v20 = vmax.f32 %v210_v18, 0.0 }
 0x1c6   :  { %661 = vmatmul.mubr.f32.vlgmr.msra.gmra.mrb[2].mxu0 %v213_v20 }
 0x1c7   :  { %730 = vmatprep.mubr.msk.f32.mxu0 %vm863_vm0, %v862_v0  ;;  %807 = vmatpush3.bf16.msra.mxu0 %v806_v27  ;;  %v413_v0 = vld [vmem:[#allocation2 + $0x1b0] sm:$0xff] }
 0x1c8   :  { %808 = vmatprep.subr.bf16.mxu0 %v864_v1  ;;  %v815_v34 = vpack.c.bf16 %v414_v33, %v413_v0 }
 0x1cb   :  { %810 = vmatpush3.bf16.msra.mxu0 %v809_v29 }
 0x1cc   :  { %811 = vmatprep.subr.bf16.mxu0 %v864_v1 }
 0x1cf   :  { %813 = vmatpush3.bf16.msra.mxu0 %v812_v32 }
 0x1d0   :  { %814 = vmatprep.subr.bf16.mxu0 %v864_v1 }
 0x1d3   :  { %816 = vmatpush3.bf16.msra.mxu0 %v815_v34 }
 0x1d4   :  { %817 = vmatprep.subr.bf16.mxu0 %v864_v1 }
 0x1d7   :  { %819 = vmatpush3.bf16.msra.mxu0 %v818_v37 }
 0x1d8   :  { %820 = vmatprep.subr.bf16.mxu0 %v864_v1 }
 0x1db   :  { %822 = vmatpush3.bf16.msra.mxu0 %v821_v40 }
 0x1dc   :  { %823 = vmatprep.subr.bf16.mxu0 %v864_v1 }
 0x1df   :  { %825 = vmatpush3.bf16.msra.mxu0 %v824_v43 }
 0x1e0   :  { %826 = vmatprep.subr.bf16.mxu0 %v864_v1 }
 0x1e3   :  { %828 = vmatpush3.bf16.msra.mxu0 %v827_v51 }
 0x299   :  { %v305_v45 = vpop.f32.mrb[2].mxu0 }
 0x29a   :  { %v306_v46 = vadd.f32 %v513_v44, %v305_v45  ;;  %v662_v47 = vpop.f32.mrb[3].mxu0 }
 0x29c   :  { %v309_v48 = vmax.f32 %v306_v46, 0.0 }
 0x29e   :  { %696 = vmatmul.mubr.f32.vlgmr.msra.gmra.mrb[2].mxu1 %v309_v48 }
 0x371   :  { %v401_v53 = vpop.f32.mrb[2].mxu1 }
 0x372   :  { %v402_v54 = vadd.f32 %v515_v52, %v401_v53  ;;  %v697_v1 = vpop.f32.mrb[3].mxu1 }
 0x374   :  { %v405_v55 = vmax.f32 %v402_v54, 0.0 }
 0x376   :  { %731 = vmatmul.mubr.f32.vlgmr.msra.gmra.mrb[4].mxu0 %v405_v55 }
 0x449   :  { %v497_v57 = vpop.f32.mrb[4].mxu0 }
 0x44a   :  { %v498_v58 = vadd.f32 %v517_v56, %v497_v57  ;;  %v732_v59 = vpop.f32.mrb[5].mxu0 }
 0x44c   :  { %501 = vst [vmem:[%s973_s4] sm:$0xff] %v498_v58 }
 0x44d   :  { %506 = vsyncpa [#allocation3], 1 }

</bundles_post_ra>
